<compile_context>
chip_gen: v7x
topology: tpu7x:2x2x1
jax: 0.10.0
libtpu: 0.0.40
codegen_flags: <defaults>
</compile_context>

<pallas_src>
import functools
import math

import jax
import jax.numpy as jnp
from jax.experimental import pallas as pl
from jax.experimental.pallas import tpu as pltpu


# --------------------------------------------------------------------------
# Helpers
# --------------------------------------------------------------------------
def _vmem_capacity_bytes():
    try:
        cap = int(pltpu.get_tpu_info().vmem_capacity_bytes)
        if cap > 0:
            return cap
    except Exception:
        pass
    return 64 * 1024 * 1024  # conservative default (v7x per-core VMEM)


def _round_up(x, m):
    return ((x + m - 1) // m) * m


def _pick_tile(c, itemsize, budget_bytes, hw, cap):
    """Largest lane-dense (multiple-of-128) HW tile within the byte budget."""
    max_useful = _round_up(hw, 128)
    t = (budget_bytes // max(1, c * itemsize)) // 128 * 128
    t = min(t, cap, max_useful)
    return max(128, int(t))


def _spatial_sum_f32(x_ref):
    """(1, C, HW) ref -> (C, 1) f32 spatial sum.

    Keeps most of the reduction on the VALU via lane-aligned 128-wide
    accumulation; a single XLU lane-reduce at the end."""
    hw = x_ref.shape[-1]
    nk = hw // 128
    if 2 <= nk <= 128:
        partial = x_ref[0, :, 0:128].astype(jnp.float32)
        for k in range(1, nk):
            partial = partial + x_ref[0, :, k * 128:(k + 1) * 128].astype(
                jnp.float32)
        s = jnp.sum(partial, axis=-1, keepdims=True)
        if hw % 128:
            s = s + jnp.sum(x_ref[0, :, nk * 128:hw].astype(jnp.float32),
                            axis=-1, keepdims=True)
        return s
    return jnp.sum(x_ref[0].astype(jnp.float32), axis=-1, keepdims=True)


# --------------------------------------------------------------------------
# Kernels
# --------------------------------------------------------------------------
def _fused_kernel(x_ref, w1t_ref, b1_ref, w2t_ref, b2_ref, o_ref, *, inv_hw):
    """Single-pass SE block for one batch element.

    x_ref:  (1, C, HW)   resident slab
    w1t:    (Cr, C)  b1: (Cr, 1)   w2t: (C, Cr)  b2: (C, 1)   (all f32)
    o_ref:  (1, C, HW)
    """
    pooled = _spatial_sum_f32(x_ref) * inv_hw                      # (C, 1) f32
    h = jnp.dot(w1t_ref[...], pooled,
                preferred_element_type=jnp.float32) + b1_ref[...]  # (Cr, 1)
    h = jnp.maximum(h, 0.0)
    g = jnp.dot(w2t_ref[...], h,
                preferred_element_type=jnp.float32) + b2_ref[...]  # (C, 1)
    gate = jax.nn.sigmoid(g)                                       # (C, 1) f32
    # Multiply in the I/O dtype (no f32 round-trip for bf16 inputs).
    o_ref[0] = x_ref[0] * gate.astype(o_ref.dtype)


def _pool_sum_kernel(x_ref, sum_ref, acc_ref):
    """Accumulate per-channel spatial sums over HW tiles (VALU accumulation).

    x_ref:   (1, C, THW)  input tile, THW % 128 == 0
    sum_ref: (1, C, 1)    f32 output (resident across the HW grid axis)
    acc_ref: (C, 128)     f32 scratch accumulator
    """
    t = pl.program_id(1)

    @pl.when(t == 0)
    def _():
        acc_ref[...] = jnp.zeros_like(acc_ref)

    nk = x_ref.shape[-1] // 128
    partial = x_ref[0, :, 0:128].astype(jnp.float32)
    for k in range(1, nk):
        partial = partial + x_ref[0, :, k * 128:(k + 1) * 128].astype(
            jnp.float32)
    acc_ref[...] += partial  # lane-aligned VALU adds only

    @pl.when(t == pl.num_programs(1) - 1)
    def _():
        # single XLU lane-reduce per batch element
        sum_ref[0] = jnp.sum(acc_ref[...], axis=-1, keepdims=True)


def _scale_kernel(x_ref, gate_ref, o_ref):
    """out = gate (per-channel, (C,1), already in x.dtype) * x tile."""
    o_ref[0] = x_ref[0] * gate_ref[0]


# --------------------------------------------------------------------------
# Wrapper
# --------------------------------------------------------------------------
def channel_attention(x_nchw, w1, b1, w2, b2, *,
                      force_two_pass=False, max_tile_hw=8192):
    """x_nchw: (B, C, H, W). w1: (C, Cr), b1: (Cr,), w2: (Cr, C), b2: (C,).

    Returns sigmoid(relu(mean_HW(x) @ w1 + b1) @ w2 + b2)[:, :, None, None] * x
    """
    B, C, H, W = x_nchw.shape
    HW = H * W
    Cr = w1.shape[1]
    assert w1.shape == (C, Cr) and w2.shape == (Cr, C)

    itemsize = jnp.dtype(x_nchw.dtype).itemsize
    cap = _vmem_capacity_bytes()
    usable = (cap * 3) // 4                      # headroom under scoped VMEM
    vmem_limit = int(min(cap - (2 << 20), (cap * 85) // 100))

    # NCHW -> (B, C, HW): pure reshape, no HBM transpose; lane-dense big axis.
    x = x_nchw.reshape(B, C, HW)
    slab_bytes = C * HW * itemsize
    w_bytes = (C * Cr * 2 + C + Cr) * 4

    # ---------------------------------------------------------------- fused
    # Double-buffered in + out slabs (~4x slab) + weights must fit the budget.
    if (not force_two_pass) and (4 * slab_bytes + w_bytes + (1 << 20) <= usable):
        w1t = jnp.asarray(w1, jnp.float32).T                  # (Cr, C)
        b1c = jnp.asarray(b1, jnp.float32).reshape(Cr, 1)
        w2t = jnp.asarray(w2, jnp.float32).T                  # (C, Cr)
        b2c = jnp.asarray(b2, jnp.float32).reshape(C, 1)

        out = pl.pallas_call(
            functools.partial(_fused_kernel, inv_hw=1.0 / float(HW)),
            out_shape=jax.ShapeDtypeStruct((B, C, HW), x_nchw.dtype),
            grid_spec=pltpu.PrefetchScalarGridSpec(
                num_scalar_prefetch=0,
                grid=(B,),
                in_specs=[
                    pl.BlockSpec((1, C, HW), lambda b: (b, 0, 0)),
                    pl.BlockSpec((Cr, C), lambda b: (0, 0)),
                    pl.BlockSpec((Cr, 1), lambda b: (0, 0)),
                    pl.BlockSpec((C, Cr), lambda b: (0, 0)),
                    pl.BlockSpec((C, 1), lambda b: (0, 0)),
                ],
                out_specs=pl.BlockSpec((1, C, HW), lambda b: (b, 0, 0)),
            ),
            compiler_params=pltpu.CompilerParams(
                dimension_semantics=("parallel",),
                vmem_limit_bytes=vmem_limit),
            cost_estimate=pl.CostEstimate(
                flops=int(2 * B * C * HW + 4 * B * C * Cr),
                transcendentals=int(B * (C + Cr)),
                bytes_accessed=int(2 * B * slab_bytes + w_bytes)),
        )(x, w1t, b1c, w2t, b2c)
        return out.reshape(B, C, H, W)

    # ------------------------------------------------------------- two-pass
    # Pass-2 double-buffers in + out (4 blocks live); pass 1 only the input.
    thw2 = _pick_tile(C, itemsize, usable // 4, HW, max_tile_hw)
    thw1 = _pick_tile(C, itemsize, usable // 2, HW, 2 * max_tile_hw)
    thw1 = max(thw2, (thw1 // thw2) * thw2)      # keep thw1 a multiple of thw2
    hw_pad = _round_up(HW, thw1)
    if hw_pad != HW:
        # zero padding is sum-neutral; mean divides by the true HW below
        x = jnp.pad(x, ((0, 0), (0, 0), (0, hw_pad - HW)))
    n_t1 = hw_pad // thw1
    n_t2 = hw_pad // thw2
    bytes_x = B * C * hw_pad * itemsize

    # ---- pass 1: per-channel spatial sum --------------------------------
    sums = pl.pallas_call(
        _pool_sum_kernel,
        out_shape=jax.ShapeDtypeStruct((B, C, 1), jnp.float32),
        grid_spec=pltpu.PrefetchScalarGridSpec(
            num_scalar_prefetch=0,
            grid=(B, n_t1),
            in_specs=[pl.BlockSpec((1, C, thw1), lambda b, t: (b, 0, t))],
            out_specs=pl.BlockSpec((1, C, 1), lambda b, t: (b, 0, 0)),
            scratch_shapes=[pltpu.VMEM((C, 128), jnp.float32)],
        ),
        compiler_params=pltpu.CompilerParams(
            dimension_semantics=("parallel", "arbitrary"),
            vmem_limit_bytes=vmem_limit),
        cost_estimate=pl.CostEstimate(
            flops=int(B * C * hw_pad),
            transcendentals=0,
            bytes_accessed=int(bytes_x + B * C * 4)),
    )(x)

    # ---- excitation MLP (tiny; hoisted out of the memory-bound sweeps) ---
    pooled = sums[:, :, 0] * (1.0 / float(HW))                       # (B, C)
    h = jnp.maximum(pooled @ jnp.asarray(w1, jnp.float32)
                    + jnp.asarray(b1, jnp.float32), 0.0)             # (B, Cr)
    s = jax.nn.sigmoid(h @ jnp.asarray(w2, jnp.float32)
                       + jnp.asarray(b2, jnp.float32))               # (B, C)
    gate = s.reshape(B, C, 1).astype(x_nchw.dtype)   # multiply in I/O dtype

    # ---- pass 2: broadcast channel scale (lane-dense stores) -------------
    out = pl.pallas_call(
        _scale_kernel,
        out_shape=jax.ShapeDtypeStruct((B, C, hw_pad), x_nchw.dtype),
        grid_spec=pltpu.PrefetchScalarGridSpec(
            num_scalar_prefetch=0,
            grid=(B, n_t2),
            in_specs=[
                pl.BlockSpec((1, C, thw2), lambda b, t: (b, 0, t)),
                pl.BlockSpec((1, C, 1), lambda b, t: (b, 0, 0)),
            ],
            out_specs=pl.BlockSpec((1, C, thw2), lambda b, t: (b, 0, t)),
        ),
        compiler_params=pltpu.CompilerParams(
            dimension_semantics=("parallel", "parallel"),
            vmem_limit_bytes=vmem_limit),
        cost_estimate=pl.CostEstimate(
            flops=int(B * C * hw_pad),
            transcendentals=0,
            bytes_accessed=int(2 * bytes_x + B * C * itemsize)),
    )(x, gate)

    return out[:, :, :HW].reshape(B, C, H, W)


# --------------------------------------------------------------------------
# Reference + self-test
# --------------------------------------------------------------------------
def _reference(x, w1, b1, w2, b2):
    pooled = jnp.mean(x, axis=(2, 3))                                 # (B, C)
    h = jnp.maximum(pooled @ w1 + b1, 0.0)                            # (B, Cr)
    s = jax.nn.sigmoid(h @ w2 + b2)                                   # (B, C)
    return s[:, :, None, None] * x


if __name__ == "__main__":
    key = jax.random.PRNGKey(0)
    B, C, H, W = 2, 16, 16, 16
    reduction = 4
    Cr = C // reduction

    k_x, k_w1, k_b1, k_w2, k_b2, k_x2 = jax.random.split(key, 6)
    x = jax.random.normal(k_x, (B, C, H, W), dtype=jnp.float32)

    # 1x1-conv weights stored as (in, out) matmul matrices (PyTorch-style
    # uniform init bounds).
    bound1 = 1.0 / math.sqrt(C)
    w1 = jax.random.uniform(k_w1, (C, Cr), jnp.float32, -bound1, bound1)
    b1 = jax.random.uniform(k_b1, (Cr,), jnp.float32, -bound1, bound1)
    bound2 = 1.0 / math.sqrt(Cr)
    w2 = jax.random.uniform(k_w2, (Cr, C), jnp.float32, -bound2, bound2)
    b2 = jax.random.uniform(k_b2, (C,), jnp.float32, -bound2, bound2)

    # ---- fused single-pass path (default) --------------------------------
    out = jax.block_until_ready(channel_attention(x, w1, b1, w2, b2))
    ref = _reference(x, w1, b1, w2, b2)
    assert out.shape == (B, C, H, W)
    assert jnp.allclose(out, ref, atol=1e-5, rtol=1e-5), "fused path mismatch"

    # ---- two-pass fallback (tiled + padded HW), exercised explicitly -----
    H2 = W2 = 24   # HW = 576: not a multiple of the forced tiles -> padding
    x2 = jax.random.normal(k_x2, (B, C, H2, W2), dtype=jnp.float32)
    out2 = jax.block_until_ready(
        channel_attention(x2, w1, b1, w2, b2,
                          force_two_pass=True, max_tile_hw=256))
    ref2 = _reference(x2, w1, b1, w2, b2)
    assert out2.shape == (B, C, H2, W2)
    assert jnp.allclose(out2, ref2, atol=1e-5, rtol=1e-5), "two-pass mismatch"

    print("KERNEL_OK")
</pallas_src>

<mosaic_0001>
module attributes {stable_mosaic.version = 11 : i64} {
  func.func @_fused_kernel(%arg0: i32, %arg1: memref<1x16x256xf32, #tpu.memory_space<vmem>>, %arg2: memref<4x16xf32, #tpu.memory_space<vmem>>, %arg3: memref<4x1xf32, #tpu.memory_space<vmem>>, %arg4: memref<16x4xf32, #tpu.memory_space<vmem>>, %arg5: memref<16x1xf32, #tpu.memory_space<vmem>>, %arg6: memref<1x16x256xf32, #tpu.memory_space<vmem>>) attributes {dimension_semantics = [#tpu.dimension_semantics<parallel>], iteration_bounds = array<i64: 2>, scalar_prefetch = 0 : i64, scratch_operands = 0 : i64, tpu.core_type = #tpu.core_type<tc>, window_params = [{transform_indices = @transform_0, window_bounds = array<i64: 1, 16, 256>}, {pipeline_mode = #tpu.pipeline_mode<synchronous>, transform_indices = @transform_1, window_bounds = array<i64: 4, 16>}, {pipeline_mode = #tpu.pipeline_mode<synchronous>, transform_indices = @transform_2, window_bounds = array<i64: 4, 1>}, {pipeline_mode = #tpu.pipeline_mode<synchronous>, transform_indices = @transform_3, window_bounds = array<i64: 16, 4>}, {pipeline_mode = #tpu.pipeline_mode<synchronous>, transform_indices = @transform_4, window_bounds = array<i64: 16, 1>}, {transform_indices = @transform_5, window_bounds = array<i64: 1, 16, 256>}]} {
    %c0 = arith.constant 0 : index
    %c0_0 = arith.constant 0 : index
    %c0_1 = arith.constant 0 : index
    %0 = vector.load %arg1[%c0, %c0_0, %c0_1] : memref<1x16x256xf32, #tpu.memory_space<vmem>>, vector<1x16x128xf32>
    %1 = vector.shape_cast %0 : vector<1x16x128xf32> to vector<16x128xf32>
    %c0_2 = arith.constant 0 : index
    %c0_3 = arith.constant 0 : index
    %c128 = arith.constant 128 : index
    %2 = vector.load %arg1[%c0_2, %c0_3, %c128] : memref<1x16x256xf32, #tpu.memory_space<vmem>>, vector<1x16x128xf32>
    %3 = vector.shape_cast %2 : vector<1x16x128xf32> to vector<16x128xf32>
    %4 = arith.addf %1, %3 : vector<16x128xf32>
    %cst = arith.constant dense<0.000000e+00> : vector<16xf32>
    %5 = vector.multi_reduction <add>, %4, %cst [1] : vector<16x128xf32> to vector<16xf32>
    %6 = vector.shape_cast %5 : vector<16xf32> to vector<16x1xf32>
    %cst_4 = arith.constant 3.906250e-03 : f32
    %7 = vector.broadcast %cst_4 : f32 to vector<16x1xf32>
    %8 = arith.mulf %6, %7 : vector<16x1xf32>
    %c0_5 = arith.constant 0 : index
    %c0_6 = arith.constant 0 : index
    %9 = vector.load %arg2[%c0_5, %c0_6] : memref<4x16xf32, #tpu.memory_space<vmem>>, vector<4x16xf32>
    %cst_7 = arith.constant dense<0.000000e+00> : vector<4x1xf32>
    %10 = tpu.matmul %9, %8, %cst_7 {dimension_numbers = #tpu.dot_dimension_numbers<[1], [0], [0], [1], [0, 0, 1, 1], [], []>} : vector<4x16xf32>, vector<16x1xf32>, vector<4x1xf32> -> vector<4x1xf32>
    %c0_8 = arith.constant 0 : index
    %c0_9 = arith.constant 0 : index
    %11 = vector.load %arg3[%c0_8, %c0_9] : memref<4x1xf32, #tpu.memory_space<vmem>>, vector<4x1xf32>
    %12 = arith.addf %10, %11 : vector<4x1xf32>
    %cst_10 = arith.constant 0.000000e+00 : f32
    %13 = vector.broadcast %cst_10 : f32 to vector<4x1xf32>
    %14 = arith.maximumf %12, %13 : vector<4x1xf32>
    %c0_11 = arith.constant 0 : index
    %c0_12 = arith.constant 0 : index
    %15 = vector.load %arg4[%c0_11, %c0_12] : memref<16x4xf32, #tpu.memory_space<vmem>>, vector<16x4xf32>
    %cst_13 = arith.constant dense<0.000000e+00> : vector<16x1xf32>
    %16 = tpu.matmul %15, %14, %cst_13 {dimension_numbers = #tpu.dot_dimension_numbers<[1], [0], [0], [1], [0, 0, 1, 1], [], []>} : vector<16x4xf32>, vector<4x1xf32>, vector<16x1xf32> -> vector<16x1xf32>
    %c0_14 = arith.constant 0 : index
    %c0_15 = arith.constant 0 : index
    %17 = vector.load %arg5[%c0_14, %c0_15] : memref<16x1xf32, #tpu.memory_space<vmem>>, vector<16x1xf32>
    %18 = arith.addf %16, %17 : vector<16x1xf32>
    %19 = arith.negf %18 : vector<16x1xf32>
    %20 = math.exp %19 : vector<16x1xf32>
    %cst_16 = arith.constant 1.000000e+00 : f32
    %21 = vector.broadcast %cst_16 : f32 to vector<16x1xf32>
    %22 = arith.addf %21, %20 : vector<16x1xf32>
    %23 = arith.divf %21, %22 : vector<16x1xf32>
    %c0_17 = arith.constant 0 : index
    %c0_18 = arith.constant 0 : index
    %c0_19 = arith.constant 0 : index
    %24 = vector.load %arg1[%c0_17, %c0_18, %c0_19] : memref<1x16x256xf32, #tpu.memory_space<vmem>>, vector<1x16x256xf32>
    %25 = vector.shape_cast %24 : vector<1x16x256xf32> to vector<16x256xf32>
    %26 = vector.broadcast %23 : vector<16x1xf32> to vector<16x256xf32>
    %27 = arith.mulf %25, %26 : vector<16x256xf32>
    %c0_20 = arith.constant 0 : index
    %c0_21 = arith.constant 0 : index
    %c0_22 = arith.constant 0 : index
    %28 = vector.load %arg6[%c0_20, %c0_21, %c0_22] : memref<1x16x256xf32, #tpu.memory_space<vmem>>, vector<1x16x256xf32>
    %29 = vector.shape_cast %28 : vector<1x16x256xf32> to vector<16x256xf32>
    %30 = vector.shape_cast %27 : vector<16x256xf32> to vector<1x16x256xf32>
    tpu.vector_store %arg6[%c0_20, %c0_21, %c0_22], %30 {strides = array<i32>} : memref<1x16x256xf32, #tpu.memory_space<vmem>>, vector<1x16x256xf32>,
    return
  }
  func.func @transform_0(%arg0: i32) -> (i32, i32, i32) {
    %c0_i32 = arith.constant 0 : i32
    %c0_i32_0 = arith.constant 0 : i32
    %c0_i32_1 = arith.constant 0 : i32
    return %arg0, %c0_i32, %c0_i32_0 : i32, i32, i32
  }
  func.func @transform_1(%arg0: i32) -> (i32, i32) {
    %c0_i32 = arith.constant 0 : i32
    %c0_i32_0 = arith.constant 0 : i32
    %c0_i32_1 = arith.constant 0 : i32
    return %c0_i32, %c0_i32_0 : i32, i32
  }
  func.func @transform_2(%arg0: i32) -> (i32, i32) {
    %c0_i32 = arith.constant 0 : i32
    %c0_i32_0 = arith.constant 0 : i32
    %c0_i32_1 = arith.constant 0 : i32
    return %c0_i32, %c0_i32_0 : i32, i32
  }
  func.func @transform_3(%arg0: i32) -> (i32, i32) {
    %c0_i32 = arith.constant 0 : i32
    %c0_i32_0 = arith.constant 0 : i32
    %c0_i32_1 = arith.constant 0 : i32
    return %c0_i32, %c0_i32_0 : i32, i32
  }
  func.func @transform_4(%arg0: i32) -> (i32, i32) {
    %c0_i32 = arith.constant 0 : i32
    %c0_i32_0 = arith.constant 0 : i32
    %c0_i32_1 = arith.constant 0 : i32
    return %c0_i32, %c0_i32_0 : i32, i32
  }
  func.func @transform_5(%arg0: i32) -> (i32, i32, i32) {
    %c0_i32 = arith.constant 0 : i32
    %c0_i32_0 = arith.constant 0 : i32
    %c0_i32_1 = arith.constant 0 : i32
    return %arg0, %c0_i32, %c0_i32_0 : i32, i32, i32
  }
}

</mosaic_0001>

<bundles_post_ra>
// kernel: tpu_custom_call.1
= control target key start
LH: loop header
LB: loop body
LE: loop exit
PB: predicated region body
PF: predicated region fallthrough
CT: control target
= control target key end

     0   :  { %10 = vsyncpa [#allocation3], 0  ;;  %s978_s0 = inlined_call_operand.hbm [shape: f32[2,16,256], index: 0, kind: input, shape index: {}]   ;;  %s979_s1 = inlined_call_operand.vmem [shape: f32[4,16], index: 1, kind: input, shape index: {}]   ;;  %s980_s2 = inlined_call_operand.vmem [shape: f32[4,1], index: 2, kind: input, shape index: {}]   ;;  %s981_s3 = inlined_call_operand.vmem [shape: f32[16,4], index: 3, kind: input, shape index: {}]   ;;  %s982_s4 = inlined_call_operand.vmem [shape: f32[16,1], index: 4, kind: input, shape index: {}]   ;;  %s983_s5 = inlined_call_operand.hbm [shape: f32[2,16,256], index: 5, kind: output, shape index: {}]  }
   0x1   :  { %12 = vsyncpa [#allocation3 + $0x1], 0 }
   0x2   :  { %13 = vsyncpa [#allocation4], 0 }
   0x3   :  { %15 = vsyncpa [#allocation4 + $0x1], 0  ;;  %s786_s18 = smov 0   ;;  %s788_s19 = smov 0  }
   0x4   :  { %s790_s20 = smov 0   ;;  %s792_s21 = smov 0  }
   0x5 LB: > { %s807_s22 = sadd.s32 4294967295, %s744_s21   ;;  %s541_s23 = sadd.s32 4294967294, %s744_s21   ;;  %s744_s21 = sphi %s792_s21, %s996_s21   ;;  %s740_s20 = sphi %s790_s20, %s995_s20   ;;  %s736_s19 = sphi %s788_s19, %s994_s19   ;;  %s732_s18 = sphi %s786_s18, %s993_s18  }
   0x6   : > { %s811_s24 = sadd.s32 1, %s744_s21   ;;  %s28_s25 = sadd.s32 1, %s740_s20 }
   0x7   : > { %s25_s26 = ssub.s32 %s744_s21, %s811_s24  ;;  %p35_p0 = scmp.ne.s32.totalorder %s740_s20, %s736_s19 }
   0x8   : > { %p26_p1 = scmp.eq.s32.totalorder %s25_s26, 0  ;;  %p36_p2 = scmp.eq.s32.totalorder %s744_s21, 0 }
   0x9   : > { %p41_p3 = scmp.ne.s32.totalorder %s736_s19, %s732_s18  ;;  %p42_p4 = scmp.eq.s32.totalorder %s807_s22, 0 }
   0xa   : > { %s823_s27 = scalar_select %p26_p1, %s740_s20, %s28_s25  }
   0xb   : > { %p825_p5 = por %p36_p2, %p35_p0  ;;  %p829_p6 = por %p42_p4, %p41_p3 }
   0xc   : > { %p149_p7 = scmp.eq.s32.totalorder %s807_s22, 1  ;;  %p155_p8 = scmp.eq.s32.totalorder %s541_s23, 1 }
   0xd   : > { %p596_p10 = scmp.lt.s32.totalorder %s744_s21, 2  ;;  %s187_s7 = sand.u32 1, %s740_s20  }
   0xe   : > { %p836_p11 = por %p149_p7, %p35_p0  ;;  %p840_p12 = por %p155_p8, %p41_p3 }
   0xf   : > { %s561_s8 = sshll.u32 %s744_s21, 9  ;;  %s544_s9 = sshll.u32 %s187_s7, 5 }
  0x10   : > { %s987_s30 = scalar_select %p836_p11, 1, 0 }
  0x11   : > { %s988_s6 = scalar_select %p840_p12, 1, 0 }
  0x12   : > { %s849_s12 = scalar_lea.hbm %s978_s0, %s561_s8  ;;  %s191_s13 = scalar_lea.vmem [#allocation2], %s544_s9 }
  0x13   : > { %s198_s14 = sshll.u32 %s191_s13, 4  ;;  %p853_p13 = pnand %p596_p10, %p825_p5  ;;  %s857_s14 = int_to_ptr.vmem [resolvable:$true] %s198_s14 }
  0x14   : > { %s859_s16 = scalar_lea.sflag [#allocation3], %s187_s7  ;;  %s648_s17 = scalar_lea.hbm %s849_s12, 512 }
  0x15   : > { %p649_p0 = scmp.ne.s32.totalorder %s849_s12, %s648_s17  ;;  %p650_p1 = pneg %p853_p13 }
  0x16   : > { %s653_s26 = scalar_lea.hbm %s978_s0, 1024  ;;  %p654_p4 = scmp.lt.u32.totalorder %s849_s12, %s978_s0 }
  0x17   : > { %p651_p2 = pnand %p650_p1, %p649_p0  ;;  %p655_p5 = scmp.lt.u32.totalorder %s653_s26, %s648_s17 }
  0x18   : > { %p657_p8 = scmp.lt.u32.totalorder %s648_s17, %s849_s12 }
  0x19   : > { %p652_p3 = pneg %p651_p2  ;;  %p656_p7 = por %p655_p5, %p654_p4 }
  0x1b   : > { %p658_p10 = por %p657_p8, %p656_p7 }
  0x1d   : > { %p659_p9 = pnand %p658_p10, %p652_p3 }
  0x1f   : > { %662 = shalt.err (!%p659_p9)
}
  0x20   : > { %s663_s7 = scalar_lea.vmem %s857_s14, 512  ;;  %s746_s9 = smov [#allocation2]  }
  0x21   : > { %p664_p0 = scmp.ne.s32.totalorder %s857_s14, %s663_s7  ;;  %s668_s10 = sshll.u32 %s746_s9, 4  ;;  %s669_s10 = int_to_ptr.vmem [resolvable:$false] %s668_s10 }
  0x22   : > { %s670_s11 = scalar_lea.vmem %s669_s10, 1024  ;;  %p671_p11 = scmp.lt.s32.totalorder %s857_s14, %s669_s10 }
  0x23   : > { %p666_p2 = pnand %p664_p0, %p650_p1  ;;  %p672_p4 = scmp.lt.s32.totalorder %s670_s11, %s663_s7 }
  0x25   : > { %p667_p12 = pneg %p666_p2  ;;  %p673_p5 = por %p672_p4, %p671_p11 }
  0x27   : > { %p674_p7 = pnand %p673_p5, %p667_p12 }
  0x29   : > { %677 = shalt.err (!%p674_p7)
}
  0x2a   : > { %s747_s13 = smov 256   ;;  %s748_s17 = smov 16  }
  0x2b   : > { %591 = dma.hbm_to_vmem [thread:$0]  (!%p853_p13), %s849_s12, 512, %s857_s14, %s859_s16, %s747_s13, %s747_s13, %s748_s17  }
  0x2c   : > { %p547_p9 = scmp.ge.s32.totalorder %s744_s21, 1  ;;  %p206_p1 = scmp.lt.s32.totalorder %s744_s21, 3 }
  0x2e   : > { %p207_p3 = pnand %p547_p9, %p206_p1 }
  0x2f   : > { %s890_s23 = sand.u32 (!%p207_p3), 1, %s736_s19  }
  0x30   : > { %210 = sbr.rel (%p207_p3) target bundleno = 820 (0x334), region = 40  ;;  %s548_s25 = sshll.u32 (!%p207_p3), %s890_s23, 5 }
  0x31   : > { %s213_s26 = scalar_lea.sflag (!%p207_p3), [#allocation3], %s890_s23  ;;  %s216_s28 = scalar_lea.vmem (!%p207_p3), [#allocation2], %s548_s25 }
  0x37   : > { %723 = dma.done.wait (%p829_p6), %s213_s26, 512  }
  0x38   : > { %725 = vsyncadd (%p829_p6), %s213_s26, 4294966784  ;;  %v243_v0 = vld [vmem:[%s216_s28] sm:$0xff]  ;;  %v245_v1 = vld [vmem:[%s216_s28 + $0x8] sm:$0xff]  ;;  %v749_v6 = vmov 0.0|0.0   ;;  %vm750_vm0 = vmmov 0   ;;  %v751_v7 = vmov 0.0  }
  0x39   : > { %v900_v2 = vld [vmem:[%s216_s28 + $0x10] sm:$0xff]  ;;  %v247_v3 = vadd.f32 %v245_v1, %v243_v0  ;;  %v902_v4 = vld [vmem:[%s216_s28 + $0x18] sm:$0xff]  ;;  %581 = vmatprep.subr.bf16.mxu0 %v749_v6  ;;  %573 = vmatprep.mubr.msk.f32.mxu0 %vm750_vm0, %v751_v7  ;;  %v255_v13 = vld [vmem:[%s979_s1] sm:$0xf]  ;;  %vm257_vm1 = vcmask 130048   ;;  %vm336_vm2 = vcmask 31744  }
  0x3a   : > { %v248_v5 = vadd.f32 %v902_v4, %v900_v2  ;;  %v332_v14 = vld [vmem:[%s981_s3] sm:$0xff]  ;;  %vm343_vm3 = vcmask 1043456   ;;  %v333_v20 = vld [vmem:[%s981_s3 + $0x8] sm:$0xff]  ;;  %v752_v21 = vmov 0   ;;  %s242_s26 = scalar_lea.vmem [#allocation5], %s548_s25  ;;  %s562_s29 = sshll.u32 %s807_s22, 9 }
  0x3b   : > { %249 = vadd.xlane.f32.xlu0 %v247_v3  ;;  %578 = vmatprep.mubr.msk.f32.mxu1 %vm336_vm2, %v332_v14  ;;  %v256_v15 = vld [vmem:[%s980_s2] sm:$0xf]  ;;  %v335_v22 = vld [vmem:[%s982_s4 + $0x8] sm:$0xff]  ;;  %s468_s28 = sshll.u32 %s242_s26, 4  ;;  %s932_s15 = scalar_lea.hbm %s983_s5, %s562_s29  ;;  %s927_s28 = int_to_ptr.vmem [resolvable:$true] %s468_s28 }
  0x3c   : > { %638 = vset.pattern.permute.xlu1 %v752_v21  ;;  %639 = vset.pattern.permute.xlu0 %v752_v21  ;;  %v334_v23 = vld [vmem:[%s982_s4] sm:$0xff]  ;;  %s455_s22 = scalar_lea.sflag [#allocation4], %s890_s23  ;;  %s678_s25 = scalar_lea.vmem %s927_s28, 512 }
  0x3d   : > { %p679_p6 = scmp.ne.s32.totalorder %s927_s28, %s678_s25  ;;  %p990_p11 = scmp.ne.s32.totalorder %s987_s30, 0 }
  0x3e   : > { %s753_s16 = smov [#allocation5]  }
  0x3f   : > { %251 = vadd.xlane.f32.xlu0 %v248_v5  ;;  %p680_p12 = pnand %p679_p6, %p990_p11  ;;  %s682_s8 = sshll.u32 %s753_s16, 4  ;;  %s683_s8 = int_to_ptr.vmem [resolvable:$false] %s682_s8 }
  0x40   : > { %s684_s7 = scalar_lea.vmem %s683_s8, 1024  ;;  %p685_p8 = scmp.lt.s32.totalorder %s927_s28, %s683_s8 }
  0x41   : > { %p681_p13 = pneg %p680_p12  ;;  %p686_p10 = scmp.lt.s32.totalorder %s684_s7, %s678_s25 }
  0x43   : > { %p687_p0 = por %p686_p10, %p685_p8 }
  0x45   : > { %p688_p2 = pnand %p687_p0, %p681_p13 }
  0xc8   : > { %v250_v8 = vpop.xlane.xlu0 %249 }
  0xc9   : > { %v253_v10 = vmul.f32 0.00390625, %v250_v8 }
  0xcc   : > { %v252_v9 = vpop.xlane.xlu0 %251 }
  0xcd   : > { %v254_v11 = vmul.f32 0.00390625, %v252_v9 }
  0xcf   : > { %v582_v12 = vpack.c.bf16 %v254_v11, %v253_v10 }
  0xd1   : > { %583 = vmatpush3.bf16.msra.mxu0 %v582_v12 }
  0xd4   : > { %574 = vmatmul.mubr.msk.f32.vlgmr.msra.gmra.mrb[0].mxu0 %vm257_vm1, %v255_v13 }
 0x1a7   : > { %v327_v16 = vpop.f32.mrb[0].mxu0 }
 0x1a8   : > { %v328_v17 = vadd.f32 %v327_v16, %v256_v15  ;;  %v575_v18 = vpop.f32.mrb[1].mxu0 }
 0x1aa   : > { %v331_v19 = vmax.f32 %v328_v17, 0.0 }
 0x1ac   : > { %576 = vmatprep.subr.msk.mxu1 %vm343_vm3, %v331_v19 }
 0x1ad   : > { %577 = vmatpush3.msk.msra.mxu1 %vm343_vm3, %v331_v19 }
 0x1ae   : > { %579 = vmatmul.mubr.msk.f32.vlgmr.msra.gmra.mrb[0].mxu1 %vm336_vm2, %v333_v20 }
 0x281   : > { %v580_v24 = vpop.f32.mrb[0].mxu1 }
 0x282   : > { %v419_v25 = vadd.f32 %v580_v24, %v335_v22  ;;  %v413_v26 = vpop.f32.mrb[1].mxu1 }
 0x283   : > { %v414_v27 = vadd.f32 %v413_v26, %v334_v23 }
 0x284   : > { %v555_v28 = vmul.f32 -1.442695, %v419_v25 }
 0x285   : > { %v554_v29 = vmul.f32 -1.442695, %v414_v27 }
 0x286   : > { %640 = vpow2.f32 %v555_v28 }
 0x287   : > { %642 = vpow2.f32 %v554_v29 }
 0x290   : > { %v641_v30 = vpop.eup %640 }
 0x291   : > { %v643_v31 = vpop.eup %642  ;;  %v429_v33 = vadd.f32 1.0, %v641_v30 }
 0x292   : > { %v428_v32 = vadd.f32 1.0, %v643_v31 }
 0x294   : > { %644 = vrcp.f32 %v428_v32 }
 0x295   : > { %646 = vrcp.f32 %v429_v33 }
 0x29e   : > { %v645_v34 = vpop.eup %644 }
 0x29f   : > { %438 = vperm.xlu1 %638, %v645_v34   ;;  %v647_v35 = vpop.eup %646 }
 0x2a3   : > { %443 = vperm.xlu1 %638, %v647_v35  }
 0x31e   : > { %v439_v36 = vpop.permute.xlu1 %438 }
 0x31f   : > { %v446_v37 = vmul.f32 %v439_v36, %v243_v0  ;;  %v447_v38 = vmul.f32 %v439_v36, %v245_v1 }
 0x321   : > { %450 = vst [vmem:[%s242_s26] sm:$0xff] %v446_v37  ;;  %451 = vst [vmem:[%s242_s26 + $0x8] sm:$0xff] %v447_v38 }
 0x322   : > { %v444_v39 = vpop.permute.xlu1 %443 }
 0x323   : > { %v448_v40 = vmul.f32 %v444_v39, %v900_v2  ;;  %v449_v41 = vmul.f32 %v444_v39, %v902_v4 }
 0x325   : > { %452 = vst [vmem:[%s242_s26 + $0x10] sm:$0xff] %v448_v40  ;;  %453 = vst [vmem:[%s242_s26 + $0x18] sm:$0xff] %v449_v41 }
 0x326   : > { %691 = shalt.err (!%p688_p2)
}
 0x327   : > { %s692_s9 = scalar_lea.hbm %s932_s15, 512  ;;  %s696_s13 = scalar_lea.hbm %s983_s5, 1024 }
 0x328   : > { %p693_p4 = scmp.ne.s32.totalorder %s932_s15, %s692_s9  ;;  %p697_p9 = scmp.lt.u32.totalorder %s932_s15, %s983_s5 }
 0x329   : > { %p698_p1 = scmp.lt.u32.totalorder %s696_s13, %s692_s9  ;;  %p700_p6 = scmp.lt.u32.totalorder %s692_s9, %s932_s15 }
 0x32a   : > { %p694_p5 = pnand %p693_p4, %p990_p11 }
 0x32b   : > { %p699_p3 = por %p698_p1, %p697_p9 }
 0x32c   : > { %p695_p7 = pneg %p694_p5 }
 0x32d   : > { %p701_p12 = por %p700_p6, %p699_p3 }
 0x32f   : > { %p702_p13 = pnand %p701_p12, %p695_p7 }
 0x331   : > { %705 = shalt.err (!%p702_p13)
}
 0x332   : > { %s754_s29 = smov 256   ;;  %s755_s12 = smov 16  }
 0x333   : > { %586 = dma.vmem_to_hbm [thread:$0]  (%p990_p11), %s927_s28, 512, %s932_s15, %s455_s22, %s754_s29, %s754_s29, %s755_s12  }
 0x334 PF: > { %s483_s14 = sand.u32 1, %s732_s18   ;;  %p991_p8 = scmp.ne.s32.totalorder %s988_s6, 0 }
 0x335   : > { %p992_p10 = scmp.ge.s32.totalorder %s744_s21, 2  ;;  %s484_s25 = scalar_lea.sflag [#allocation4], %s483_s14 }
 0x337   : > { %p593_p0 = pnand %p992_p10, %p991_p8 }
 0x339   : > { %727 = dma.done.wait (!%p593_p0), %s484_s25, 512  }
 0x33a   : > { %729 = vsyncadd (!%p593_p0), %s484_s25, 4294966784  ;;  %p18_p2 = scmp.ge.s32.totalorder %s811_s24, 4   ;;  %s993_s18 = smov %s736_s19 }
 0x33b   : > { %s994_s19 = smov %s740_s20  ;;  %s995_s20 = smov %s823_s27 }
 0x33c   : > { %s996_s21 = smov %s811_s24  ;;  %20 = sbr.rel (!%p18_p2) target bundleno = 5 (0x5), region = 85 }
 0x343   :  { %489 = vsyncpa [#allocation3], 1 }
 0x344   :  { %491 = vsyncpa [#allocation3 + $0x1], 1 }
 0x345   :  { %492 = vsyncpa [#allocation4], 1 }
 0x346   :  { %494 = vsyncpa [#allocation4 + $0x1], 1 }

</bundles_post_ra>
